<compile_context>
chip_gen: v6e
topology: v6e:2x2x1
jax: 0.10.0
libtpu: 0.0.40
codegen_flags: <defaults>
</compile_context>

<pallas_src>
import jax
import jax.numpy as jnp
from jax.experimental import pallas as pl
from jax.experimental.pallas import tpu as pltpu


def _round_up(x, m):
    return ((x + m - 1) // m) * m


def _choose_tiling(B, max_block):
    """Padding-aware batch tiling.

    Pads B to a multiple of 128 (lane-dense output) and picks TB (a 128-multiple
    <= max_block) that (a) keeps total padded rows near-minimal and (b) prefers
    an even tile count when the grid is short, so the v7x megacore can split the
    "parallel" batch axis evenly across its two TensorCores.
    """
    B128 = _round_up(B, 128)
    cands = []
    for n in range(1, B128 // 128 + 1):
        TB = _round_up(-(-B // n), 128)           # ceil(B/n) rounded to 128
        if TB > max_block:
            continue
        cands.append((n, TB, n * TB))
    min_pad = min(c[2] for c in cands)
    slack = max(128, min_pad // 32)               # allow ~3% extra padding for a better split
    good = [c for c in cands if c[2] <= min_pad + slack]

    def rank(c):
        n, _, padded = c
        # Even split only matters when the grid is short (few tiles per core);
        # otherwise prefer fewest / fattest tiles to amortize per-step overhead.
        odd_penalty = (n % 2) if n <= 16 else 0
        return (odd_penalty, n, padded)

    num_tiles, TB, B_pad = min(good, key=rank)
    return num_tiles, TB, B_pad


def _critic_kernel(x_ref, w1_ref, b1_ref, w2_ref, b2_ref, w3_ref, o_ref):
    # Layer 1: (TB, S) @ (S, H) — bf16 MXU operands, f32 accumulate;
    # bias add + tanh in f32 (VPU / EUP).
    h1 = jnp.tanh(
        jnp.dot(x_ref[...], w1_ref[...], preferred_element_type=jnp.float32)
        + b1_ref[...]
    )
    # Layer 2: cast the activation to the MXU dtype, keep f32 accumulation.
    h2 = jnp.tanh(
        jnp.dot(h1.astype(w2_ref.dtype), w2_ref[...],
                preferred_element_type=jnp.float32)
        + b2_ref[...]
    )
    # Layer 3 (output width 1): f32 VPU multiply + lane reduction instead of a
    # nearly-empty N=1 MXU matmul.  b3 is folded in by the wrapper.
    v = jnp.sum(h2 * w3_ref[...], axis=-1)                       # (TB,)
    # Lane-dense store: batch lives on the 128-lane axis of the output block.
    o_ref[...] = v.reshape(o_ref.shape).astype(o_ref.dtype)


def critic_forward(state, params, *, block_batch=2048, mxu_dtype=jnp.bfloat16):
    """state: (B, stateDim) float32. params: dict of (pre-transposed) weights/biases."""
    B, S = state.shape
    H = params["w1"].shape[1]

    num_tiles, TB, B_pad = _choose_tiling(B, max(128, block_batch))

    # MXU operands in bf16 (halves streamed state bytes); biases / w3 stay f32.
    x = state.astype(mxu_dtype)
    if B_pad != B:
        x = jnp.pad(x, ((0, B_pad - B), (0, 0)))
    w1 = params["w1"].astype(mxu_dtype)
    w2 = params["w2"].astype(mxu_dtype)
    b1, b2, w3 = params["b1"], params["b2"], params["w3"]

    # The state tile is the only pipelined operand; triple-buffer it on long
    # grids so the tiny compute body is not exposed to DMA issue latency.
    if num_tiles >= 4:
        x_spec = pl.BlockSpec((TB, S), lambda i: (i, 0), pipeline_mode=pl.Buffered(3))
    else:
        x_spec = pl.BlockSpec((TB, S), lambda i: (i, 0))

    # VMEM budget against PADDED tile bytes (x lanes pad S->128, h1/h2 pad H->128,
    # output block pads to 8 sublanes).  Only raise the limit when needed; keep
    # well under v7x's 64 MiB physical VMEM.
    est_vmem = TB * (3 * 128 * 2 + 2 * 128 * 4 + 2 * 8 * 4) + (1 << 20)
    vmem_limit = min(est_vmem, 60 << 20) if est_vmem > (32 << 20) else None

    cost = pl.CostEstimate(
        flops=2 * B_pad * (S * H + H * H + H),
        transcendentals=2 * B_pad * H,
        bytes_accessed=(2 * B_pad * S + 4 * B_pad
                        + 2 * (S * H + H * H) + 4 * 3 * H),
    )

    out = pl.pallas_call(
        _critic_kernel,
        out_shape=jax.ShapeDtypeStruct((num_tiles, 1, TB), jnp.float32),
        grid=(num_tiles,),
        in_specs=[
            x_spec,                                    # state tile (pipelined, bf16)
            pl.BlockSpec((S, H), lambda i: (0, 0)),    # w1 (resident, bf16)
            pl.BlockSpec((1, H), lambda i: (0, 0)),    # b1 (f32)
            pl.BlockSpec((H, H), lambda i: (0, 0)),    # w2 (resident, bf16)
            pl.BlockSpec((1, H), lambda i: (0, 0)),    # b2 (f32)
            pl.BlockSpec((1, H), lambda i: (0, 0)),    # w3 as a row (f32)
        ],
        out_specs=pl.BlockSpec((1, 1, TB), lambda i: (i, 0, 0)),
        compiler_params=pltpu.CompilerParams(
            dimension_semantics=("parallel",),
            vmem_limit_bytes=vmem_limit,
        ),
        cost_estimate=cost,
    )(x, w1, b1, w2, b2, w3)

    # (num_tiles, 1, TB) -> (B, 1), dropping batch padding; fold the scalar b3 here.
    return out.reshape(B_pad)[:B].reshape(B, 1) + params["b3"]


def init_critic_params(key, state_dim, hidden_size=64):
    """Deterministic synthetic init (shapes match the nn.Linear layers).

    w1/w2 stored transposed to (in_features, out_features); w3 stored as a
    (1, hidden) row; biases as (1, out) / (1, 1) for clean broadcasting.
    """
    k1, k2, k3, k4, k5, k6 = jax.random.split(key, 6)

    def unif(k, shape, fan_in):
        bound = 1.0 / jnp.sqrt(fan_in)
        return jax.random.uniform(k, shape, jnp.float32, -bound, bound)

    return {
        "w1": unif(k1, (state_dim, hidden_size), state_dim),
        "b1": unif(k2, (1, hidden_size), state_dim),
        "w2": unif(k3, (hidden_size, hidden_size), hidden_size),
        "b2": unif(k4, (1, hidden_size), hidden_size),
        "w3": unif(k5, (1, hidden_size), hidden_size),
        "b3": unif(k6, (1, 1), hidden_size),
    }


def critic_reference(state, params):
    """Pure-JAX f32 reference for correctness check."""
    h1 = jnp.tanh(state @ params["w1"] + params["b1"])
    h2 = jnp.tanh(h1 @ params["w2"] + params["b2"])
    return jnp.sum(h2 * params["w3"], axis=-1, keepdims=True) + params["b3"]


if __name__ == "__main__":
    key = jax.random.PRNGKey(0)
    k_param, k_state = jax.random.split(key)

    state_dim = 16
    hidden = 64
    params = init_critic_params(k_param, state_dim, hidden)

    # Aligned, ragged (padding path), awkward (padding-aware tiling: 1200 ->
    # 2 tiles of 640), and long-grid (4 tiles -> Buffered(3) path) batch sizes.
    for batch in (256, 37, 1200, 4500):
        k_state, sub = jax.random.split(k_state)
        state = jax.random.normal(sub, (batch, state_dim), jnp.float32)

        out = jax.block_until_ready(critic_forward(state, params))
        ref = critic_reference(state, params)

        assert out.shape == (batch, 1), out.shape
        # Tolerance deliberately relaxed vs. full-f32: the kernel feeds bf16
        # operands to the MXU (f32 accumulation), per the perf review.
        assert jnp.allclose(out, ref, atol=3e-2, rtol=3e-2), (
            f"B={batch}: max abs err = {jnp.max(jnp.abs(out - ref))}"
        )

    print("KERNEL_OK")
</pallas_src>

<mosaic_0001>
module attributes {stable_mosaic.version = 11 : i64} {
  func.func @_critic_kernel(%arg0: i32, %arg1: memref<128x16xbf16, #tpu.memory_space<vmem>>, %arg2: memref<16x64xbf16, #tpu.memory_space<vmem>>, %arg3: memref<1x64xf32, #tpu.memory_space<vmem>>, %arg4: memref<64x64xbf16, #tpu.memory_space<vmem>>, %arg5: memref<1x64xf32, #tpu.memory_space<vmem>>, %arg6: memref<1x64xf32, #tpu.memory_space<vmem>>, %arg7: memref<1x1x128xf32, #tpu.memory_space<vmem>>) attributes {dimension_semantics = [#tpu.dimension_semantics<parallel>], iteration_bounds = array<i64: 2>, scalar_prefetch = 0 : i64, scratch_operands = 0 : i64, tpu.core_type = #tpu.core_type<tc>, window_params = [{transform_indices = @transform_0, window_bounds = array<i64: 128, 16>}, {pipeline_mode = #tpu.pipeline_mode<synchronous>, transform_indices = @transform_1, window_bounds = array<i64: 16, 64>}, {pipeline_mode = #tpu.pipeline_mode<synchronous>, transform_indices = @transform_2, window_bounds = array<i64: 1, 64>}, {pipeline_mode = #tpu.pipeline_mode<synchronous>, transform_indices = @transform_3, window_bounds = array<i64: 64, 64>}, {pipeline_mode = #tpu.pipeline_mode<synchronous>, transform_indices = @transform_4, window_bounds = array<i64: 1, 64>}, {pipeline_mode = #tpu.pipeline_mode<synchronous>, transform_indices = @transform_5, window_bounds = array<i64: 1, 64>}, {transform_indices = @transform_6, window_bounds = array<i64: 1, 1, 128>}]} {
    %c0 = arith.constant 0 : index
    %c0_0 = arith.constant 0 : index
    %0 = vector.load %arg1[%c0, %c0_0] : memref<128x16xbf16, #tpu.memory_space<vmem>>, vector<128x16xbf16>
    %c0_1 = arith.constant 0 : index
    %c0_2 = arith.constant 0 : index
    %1 = vector.load %arg2[%c0_1, %c0_2] : memref<16x64xbf16, #tpu.memory_space<vmem>>, vector<16x64xbf16>
    %cst = arith.constant dense<0.000000e+00> : vector<128x64xf32>
    %2 = tpu.matmul %0, %1, %cst {dimension_numbers = #tpu.dot_dimension_numbers<[1], [0], [0], [1], [0, 0, 1, 1], [], []>} : vector<128x16xbf16>, vector<16x64xbf16>, vector<128x64xf32> -> vector<128x64xf32>
    %c0_3 = arith.constant 0 : index
    %c0_4 = arith.constant 0 : index
    %3 = vector.load %arg3[%c0_3, %c0_4] : memref<1x64xf32, #tpu.memory_space<vmem>>, vector<1x64xf32>
    %4 = vector.broadcast %3 : vector<1x64xf32> to vector<128x64xf32>
    %5 = arith.addf %2, %4 : vector<128x64xf32>
    %6 = math.tanh %5 : vector<128x64xf32>
    %7 = arith.truncf %6 : vector<128x64xf32> to vector<128x64xbf16>
    %c0_5 = arith.constant 0 : index
    %c0_6 = arith.constant 0 : index
    %8 = vector.load %arg4[%c0_5, %c0_6] : memref<64x64xbf16, #tpu.memory_space<vmem>>, vector<64x64xbf16>
    %cst_7 = arith.constant dense<0.000000e+00> : vector<128x64xf32>
    %9 = tpu.matmul %7, %8, %cst_7 {dimension_numbers = #tpu.dot_dimension_numbers<[1], [0], [0], [1], [0, 0, 1, 1], [], []>} : vector<128x64xbf16>, vector<64x64xbf16>, vector<128x64xf32> -> vector<128x64xf32>
    %c0_8 = arith.constant 0 : index
    %c0_9 = arith.constant 0 : index
    %10 = vector.load %arg5[%c0_8, %c0_9] : memref<1x64xf32, #tpu.memory_space<vmem>>, vector<1x64xf32>
    %11 = vector.broadcast %10 : vector<1x64xf32> to vector<128x64xf32>
    %12 = arith.addf %9, %11 : vector<128x64xf32>
    %13 = math.tanh %12 : vector<128x64xf32>
    %c0_10 = arith.constant 0 : index
    %c0_11 = arith.constant 0 : index
    %14 = vector.load %arg6[%c0_10, %c0_11] : memref<1x64xf32, #tpu.memory_space<vmem>>, vector<1x64xf32>
    %15 = vector.broadcast %14 : vector<1x64xf32> to vector<128x64xf32>
    %16 = arith.mulf %13, %15 : vector<128x64xf32>
    %cst_12 = arith.constant dense<0.000000e+00> : vector<128xf32>
    %17 = vector.multi_reduction <add>, %16, %cst_12 [1] : vector<128x64xf32> to vector<128xf32>
    %18 = vector.shape_cast %17 : vector<128xf32> to vector<1x1x128xf32>
    %c0_13 = arith.constant 0 : index
    %c0_14 = arith.constant 0 : index
    %c0_15 = arith.constant 0 : index
    %19 = vector.load %arg7[%c0_13, %c0_14, %c0_15] : memref<1x1x128xf32, #tpu.memory_space<vmem>>, vector<1x1x128xf32>
    tpu.vector_store %arg7[%c0_13, %c0_14, %c0_15], %18 {strides = array<i32>} : memref<1x1x128xf32, #tpu.memory_space<vmem>>, vector<1x1x128xf32>,
    return
  }
  func.func @transform_0(%arg0: i32) -> (i32, i32) {
    %c0_i32 = arith.constant 0 : i32
    %c0_i32_0 = arith.constant 0 : i32
    return %arg0, %c0_i32 : i32, i32
  }
  func.func @transform_1(%arg0: i32) -> (i32, i32) {
    %c0_i32 = arith.constant 0 : i32
    %c0_i32_0 = arith.constant 0 : i32
    %c0_i32_1 = arith.constant 0 : i32
    return %c0_i32, %c0_i32_0 : i32, i32
  }
  func.func @transform_2(%arg0: i32) -> (i32, i32) {
    %c0_i32 = arith.constant 0 : i32
    %c0_i32_0 = arith.constant 0 : i32
    %c0_i32_1 = arith.constant 0 : i32
    return %c0_i32, %c0_i32_0 : i32, i32
  }
  func.func @transform_3(%arg0: i32) -> (i32, i32) {
    %c0_i32 = arith.constant 0 : i32
    %c0_i32_0 = arith.constant 0 : i32
    %c0_i32_1 = arith.constant 0 : i32
    return %c0_i32, %c0_i32_0 : i32, i32
  }
  func.func @transform_4(%arg0: i32) -> (i32, i32) {
    %c0_i32 = arith.constant 0 : i32
    %c0_i32_0 = arith.constant 0 : i32
    %c0_i32_1 = arith.constant 0 : i32
    return %c0_i32, %c0_i32_0 : i32, i32
  }
  func.func @transform_5(%arg0: i32) -> (i32, i32) {
    %c0_i32 = arith.constant 0 : i32
    %c0_i32_0 = arith.constant 0 : i32
    %c0_i32_1 = arith.constant 0 : i32
    return %c0_i32, %c0_i32_0 : i32, i32
  }
  func.func @transform_6(%arg0: i32) -> (i32, i32, i32) {
    %c0_i32 = arith.constant 0 : i32
    %c0_i32_0 = arith.constant 0 : i32
    %c0_i32_1 = arith.constant 0 : i32
    return %arg0, %c0_i32, %c0_i32_0 : i32, i32, i32
  }
}

</mosaic_0001>

<bundles_post_ra>
// kernel: tpu_custom_call.1
= control target key start
LH: loop header
LB: loop body
LE: loop exit
PB: predicated region body
PF: predicated region fallthrough
CT: control target
= control target key end

     0   :  { %11 = vsyncpa [#allocation3], 0  ;;  %s1452_s0 = inlined_call_operand.vmem [shape: bf16[256,16], index: 0, kind: input, shape index: {}]   ;;  %s1453_s1 = inlined_call_operand.vmem [shape: bf16[16,64], index: 1, kind: input, shape index: {}]   ;;  %s1454_s2 = inlined_call_operand.vmem [shape: f32[1,64], index: 2, kind: input, shape index: {}]   ;;  %s1455_s3 = inlined_call_operand.vmem [shape: bf16[64,64], index: 3, kind: input, shape index: {}]   ;;  %s1456_s4 = inlined_call_operand.vmem [shape: f32[1,64], index: 4, kind: input, shape index: {}]   ;;  %s1457_s5 = inlined_call_operand.vmem [shape: f32[1,64], index: 5, kind: input, shape index: {}]   ;;  %s1458_s6 = inlined_call_operand.hbm [shape: f32[2,1,128], index: 6, kind: output, shape index: {}]  }
   0x1   :  { %13 = vsyncpa [#allocation3 + $0x1], 0  ;;  %s1232_s21 = smov 0   ;;  %s1234_s22 = smov 0  }
   0x2   :  { %s1236_s23 = smov 0   ;;  %s1238_s24 = smov 0  }
   0x3 LB: > { %s913_s25 = sadd.s32 4294967295, %s1194_s24   ;;  %s914_s26 = sadd.s32 4294967294, %s1194_s24   ;;  %s1194_s24 = sphi %s1238_s24, %s1464_s24   ;;  %s1190_s23 = sphi %s1236_s23, %s1463_s23   ;;  %s1186_s22 = sphi %s1234_s22, %s1462_s22   ;;  %s1182_s21 = sphi %s1232_s21, %s1461_s21  }
   0x4   : > { %s1255_s27 = sadd.s32 1, %s1194_s24   ;;  %s157_s28 = sadd.s32 1, %s1190_s23 }
   0x5   : > { %s154_s29 = ssub.s32 %s1194_s24, %s1255_s27  ;;  %p167_p0 = scmp.ne.s32.totalorder %s1190_s23, %s1186_s22 }
   0x6   : > { %p155_p1 = scmp.eq.s32.totalorder %s154_s29, 0  ;;  %p168_p2 = scmp.eq.s32.totalorder %s913_s25, 1 }
   0x7   : > { %p173_p3 = scmp.ne.s32.totalorder %s1186_s22, %s1182_s21  ;;  %p174_p4 = scmp.eq.s32.totalorder %s914_s26, 1 }
   0x8   : > { %s1265_s30 = scalar_select %p155_p1, %s1190_s23, %s157_s28  }
   0x9   : > { %p1267_p5 = por %p168_p2, %p167_p0  ;;  %p1271_p6 = por %p174_p4, %p173_p3 }
   0xa   : > { %p917_p7 = scmp.ge.s32.totalorder %s1194_s24, 1  ;;  %p216_p8 = scmp.lt.s32.totalorder %s1194_s24, 3 }
   0xc   : > { %p217_p9 = pnand %p917_p7, %p216_p8 }
   0xd   : > { %s1280_s11 = sshll.u32 (!%p217_p9), %s913_s25, 4  ;;  %s1196_s29 = smov (!%p217_p9), [#allocation2]  }
   0xe   : > { %220 = sbr.rel (%p217_p9) target bundleno = 643 (0x283), region = 44  ;;  %p246_p10 = scmp.lt.s32.totalorder (!%p217_p9), %s1280_s11, 31 }
   0xf   : > { %s1417_s25 = scalar_lea.hbm (!%p217_p9), %s1458_s6, %s1280_s11  ;;  %s1138_s9 = sshll.u32 (!%p217_p9), %s1196_s29, 4  ;;  %s1139_s9 = int_to_ptr.vmem [resolvable:$false] %s1138_s9 }
  0x10   : > { %s1140_s10 = scalar_lea.vmem (!%p217_p9), %s1139_s9, 32 }
  0x13   : > { %v1057_v0 = vld [vmem:[%s1453_s1] sm:$0xff]   ;;  %s247_s12 = scalar_select %p246_p10, %s1280_s11, 31  ;;  %vm323_vm0 = vcmask 130048   ;;  %v1066_v9 = vld [vmem:[%s1455_s3 + $0x18] sm:$0xff]   ;;  %v1067_v10 = vld [vmem:[%s1455_s3 + $0x10] sm:$0xff]   ;;  %vm508_vm1 = vcmask 523264  }
  0x14   : > { %976 = vmatprep.subr.bf16.mxu0 %v1057_v0  ;;  %994 = vmatprep.subr.bf16.mxu1 %v1066_v9  ;;  %v1068_v11 = vld [vmem:[%s1455_s3 + $0x8] sm:$0xff]   ;;  %v1069_v12 = vld [vmem:[%s1455_s3] sm:$0xff]   ;;  %vm744_vm2 = vcmask 130112   ;;  %vm751_vm3 = vcmask 195712   ;;  %vm758_vm4 = vcmask 261312   ;;  %vm765_vm5 = vcmask 326912  }
  0x15   : > { %977 = vmatpush3.bf16.msra.mxu0 %v1057_v0  ;;  %s919_s13 = sshll.u32 %s247_s12, 2  ;;  %995 = vmatpush3.bf16.msra.mxu1 %v1066_v9  ;;  %v920_v14 = vld [vmem:[%s1454_s2] ss:$0 sm:$0xff]  ;;  %vm772_vm6 = vcmask 392512   ;;  %vm779_vm7 = vcmask 458112   ;;  %vm786_vm8 = vcmask 523712  }
  0x16   : > { %s249_s16 = scalar_lea.vmem %s1452_s0, %s919_s13  ;;  %996 = vmatprep.subr.bf16.mxu1 %v1067_v10  ;;  %vm793_vm9 = vcmask 589312   ;;  %vm800_vm10 = vcmask 654912   ;;  %vm807_vm11 = vcmask 720512   ;;  %vm814_vm12 = vcmask 786112  }
  0x17   : > { %v1058_v1 = vld [vmem:[%s249_s16] sm:$0xff]   ;;  %v1059_v2 = vld [vmem:[%s249_s16 + $0x8] sm:$0xff]   ;;  %v1060_v3 = vld [vmem:[%s249_s16 + $0x10] sm:$0xff]   ;;  %vm821_vm13 = vcmask 851712   ;;  %vm828_vm14 = vcmask 917312   ;;  %vm835_vm15 = vcmask 982912  }
  0x18   : > { %978 = vmatprep.mubr.msk.bf16.mxu0 %vm323_vm0, %v1058_v1  ;;  %v1061_v4 = vld [vmem:[%s249_s16 + $0x18] sm:$0xff]   ;;  %v1062_v5 = vld [vmem:[%s249_s16 + $0x20] sm:$0xff]   ;;  %v1063_v6 = vld [vmem:[%s249_s16 + $0x28] sm:$0xff]  }
  0x19   : > { %979 = vmatmul.mubr.msk.bf16.vlgmr.msra.gmra.mxu0 %vm323_vm0, %v1059_v2  ;;  %v1064_v7 = vld [vmem:[%s249_s16 + $0x30] sm:$0xff]   ;;  %v1065_v8 = vld [vmem:[%s249_s16 + $0x38] sm:$0xff]   ;;  %997 = vmatpush3.bf16.msra.mxu1 %v1067_v10  ;;  %s243_s16 = sand.u32 1, %s1186_s22  }
  0x1a   : > { %982 = vmatprep.mubr.msk.bf16.mxu0 %vm323_vm0, %v1060_v3  ;;  %998 = vmatprep.subr.bf16.mxu1 %v1068_v11  ;;  %s244_s17 = scalar_lea.vmem [#allocation2], %s243_s16  ;;  %s847_s26 = scalar_lea.sflag [#allocation3], %s243_s16 }
  0x1b   : > { %s859_s18 = sshll.u32 %s244_s17, 4  ;;  %s860_s18 = int_to_ptr.vmem [resolvable:$true] %s859_s18 }
  0x1c   : > { %s1134_s28 = scalar_lea.vmem %s860_s18, 16  ;;  %p1141_p0 = scmp.lt.s32.totalorder %s860_s18, %s1139_s9 }
  0x1d   : > { %999 = vmatpush3.bf16.msra.mxu1 %v1068_v11  ;;  %p1135_p11 = scmp.ne.s32.totalorder %s860_s18, %s1134_s28  ;;  %p1142_p1 = scmp.lt.s32.totalorder %s1140_s10, %s1134_s28 }
  0x1e   : > { %1000 = vmatprep.subr.bf16.mxu1 %v1069_v12 }
  0x1f   : > { %p1136_p12 = pnand %p1135_p11, %p1267_p5  ;;  %p1143_p2 = por %p1142_p1, %p1141_p0 }
  0x21   : > { %983 = vmatmul.mubr.msk.bf16.gmra.mxu0 %vm323_vm0, %v1061_v4  ;;  %1001 = vmatpush3.bf16.msra.mxu1 %v1069_v12  ;;  %p1137_p13 = pneg %p1136_p12 }
  0x22   : > { %986 = vmatprep.mubr.msk.bf16.mxu0 %vm323_vm0, %v1062_v5 }
  0x23   : > { %p1144_p3 = pnand %p1143_p2, %p1137_p13 }
  0x29   : > { %987 = vmatmul.mubr.msk.bf16.gmra.mxu0 %vm323_vm0, %v1063_v6  ;;  %v1321_v6 = vld [vmem:[%s1456_s4] ss:$0 sm:$0xff] }
  0x2a   : > { %990 = vmatprep.mubr.msk.bf16.mxu0 %vm323_vm0, %v1064_v7 }
  0x31   : > { %991 = vmatmul.mubr.msk.bf16.gmra.mxu0 %vm323_vm0, %v1065_v8  ;;  %vm842_vm0 = vcmask 1048512  }
  0xd9   : > { %v980_v13 = vpop.f32.mrf.mxu0 }
  0xda   : > { %v391_v19 = vadd.f32 %v980_v13, %v920_v14 }
  0xdb   : > { %v382_v15 = vpop.f32.mrf.mxu0 }
  0xdc   : > { %v383_v16 = vadd.f32 %v920_v14, %v382_v15 }
  0xdd   : > { %v981_v17 = vpop.f32.mrf.mxu0 }
  0xde   : > { %v394_v18 = vadd.f32 %v981_v17, %v920_v14  ;;  %1070 = vtanh.f32 %v383_v16 }
  0xdf   : > { %v385_v20 = vpop.f32.mrf.mxu0 }
  0xe0   : > { %v386_v21 = vadd.f32 %v920_v14, %v385_v20  ;;  %1072 = vtanh.f32 %v394_v18 }
  0xe1   : > { %v984_v22 = vpop.f32.mrf.mxu0 }
  0xe2   : > { %1074 = vtanh.f32 %v386_v21  ;;  %v407_v27 = vadd.f32 %v984_v22, %v920_v14  ;;  %v1333_v22 = vld [vmem:[%s1457_s5] ss:$0 sm:$0xff] }
  0xe3   : > { %1076 = vtanh.f32 %v391_v19  ;;  %v398_v23 = vpop.f32.mrf.mxu0 }
  0xe4   : > { %v399_v24 = vadd.f32 %v920_v14, %v398_v23 }
  0xe5   : > { %v985_v25 = vpop.f32.mrf.mxu0 }
  0xe6   : > { %v410_v26 = vadd.f32 %v985_v25, %v920_v14  ;;  %1078 = vtanh.f32 %v399_v24 }
  0xe7   : > { %v401_v28 = vpop.f32.mrf.mxu0 }
  0xe8   : > { %v402_v29 = vadd.f32 %v920_v14, %v401_v28  ;;  %1080 = vtanh.f32 %v410_v26 }
  0xe9   : > { %v988_v30 = vpop.f32.mrf.mxu0 }
  0xea   : > { %1082 = vtanh.f32 %v402_v29  ;;  %v423_v38 = vadd.f32 %v988_v30, %v920_v14 }
  0xeb   : > { %1084 = vtanh.f32 %v407_v27  ;;  %v414_v31 = vpop.f32.mrf.mxu0  ;;  %v1071_v33 = vpop.eup %1070 }
  0xec   : > { %v415_v32 = vadd.f32 %v920_v14, %v414_v31 }
  0xed   : > { %v989_v34 = vpop.f32.mrf.mxu0  ;;  %v1073_v35 = vpop.eup %1072 }
  0xee   : > { %v426_v36 = vadd.f32 %v989_v34, %v920_v14  ;;  %1086 = vtanh.f32 %v415_v32 }
  0xef   : > { %v1075_v37 = vpop.eup %1074  ;;  %v417_v39 = vpop.f32.mrf.mxu0 }
  0xf0   : > { %v1077_v40 = vpop.eup %1076  ;;  %v418_v41 = vadd.f32 %v920_v14, %v417_v39  ;;  %v461_v42 = vpack.c.bf16 %v1075_v37, %v1071_v33  ;;  %1088 = vtanh.f32 %v426_v36 }
  0xf1   : > { %v992_v43 = vpop.f32.mrf.mxu0  ;;  %v462_v44 = vpack.c.bf16 %v1073_v35, %v1077_v40 }
  0xf2   : > { %1090 = vtanh.f32 %v418_v41  ;;  %1002 = vmatprep.mubr.msk.bf16.mxu1 %vm508_vm1, %v461_v42  ;;  %v439_v52 = vadd.f32 %v992_v43, %v920_v14 }
  0xf3   : > { %1092 = vtanh.f32 %v423_v38  ;;  %v430_v45 = vpop.f32.mrf.mxu0  ;;  %1003 = vmatmul.mubr.msk.bf16.vlgmr.msra.gmra.mxu1 %vm508_vm1, %v462_v44  ;;  %v1079_v47 = vpop.eup %1078 }
  0xf4   : > { %v431_v46 = vadd.f32 %v920_v14, %v430_v45 }
  0xf5   : > { %v993_v48 = vpop.f32.mrf.mxu0  ;;  %v1081_v49 = vpop.eup %1080 }
  0xf6   : > { %v442_v50 = vadd.f32 %v993_v48, %v920_v14  ;;  %1094 = vtanh.f32 %v431_v46 }
  0xf7   : > { %v1083_v51 = vpop.eup %1082  ;;  %v433_v53 = vpop.f32.mrf.mxu0 }
  0xf8   : > { %v1085_v54 = vpop.eup %1084  ;;  %v434_v55 = vadd.f32 %v920_v14, %v433_v53  ;;  %v463_v56 = vpack.c.bf16 %v1083_v51, %v1079_v47  ;;  %1096 = vtanh.f32 %v442_v50 }
  0xf9   : > { %v464_v57 = vpack.c.bf16 %v1081_v49, %v1085_v54 }
  0xfa   : > { %1098 = vtanh.f32 %v434_v55  ;;  %1006 = vmatprep.mubr.msk.bf16.mxu1 %vm508_vm1, %v463_v56 }
  0xfb   : > { %1100 = vtanh.f32 %v439_v52  ;;  %1007 = vmatmul.mubr.msk.bf16.gmra.mxu1 %vm508_vm1, %v464_v57  ;;  %v1087_v58 = vpop.eup %1086 }
  0xfd   : > { %v1089_v59 = vpop.eup %1088 }
  0xff   : > { %v1091_v60 = vpop.eup %1090 }
 0x100   : > { %v1093_v61 = vpop.eup %1092  ;;  %v465_v62 = vpack.c.bf16 %v1091_v60, %v1087_v58 }
 0x101   : > { %v466_v63 = vpack.c.bf16 %v1089_v59, %v1093_v61 }
 0x102   : > { %1010 = vmatprep.mubr.msk.bf16.mxu1 %vm508_vm1, %v465_v62 }
 0x103   : > { %1011 = vmatmul.mubr.msk.bf16.gmra.mxu1 %vm508_vm1, %v466_v63  ;;  %v1095_v0 = vpop.eup %1094 }
 0x105   : > { %v1097_v1 = vpop.eup %1096 }
 0x107   : > { %v1099_v2 = vpop.eup %1098 }
 0x108   : > { %v1101_v3 = vpop.eup %1100  ;;  %v467_v4 = vpack.c.bf16 %v1099_v2, %v1095_v0 }
 0x109   : > { %v468_v5 = vpack.c.bf16 %v1097_v1, %v1101_v3 }
 0x10a   : > { %1014 = vmatprep.mubr.msk.bf16.mxu1 %vm508_vm1, %v467_v4 }
 0x10b   : > { %1015 = vmatmul.mubr.msk.bf16.gmra.mxu1 %vm508_vm1, %v468_v5 }
 0x1b3   : > { %v1004_v7 = vpop.f32.mrf.mxu1 }
 0x1b4   : > { %v576_v8 = vadd.f32 %v1004_v7, %v1321_v6 }
 0x1b5   : > { %v567_v9 = vpop.f32.mrf.mxu1 }
 0x1b6   : > { %1102 = vtanh.f32 %v576_v8  ;;  %v568_v10 = vadd.f32 %v1321_v6, %v567_v9 }
 0x1b7   : > { %v1005_v11 = vpop.f32.mrf.mxu1 }
 0x1b8   : > { %1104 = vtanh.f32 %v568_v10  ;;  %v579_v12 = vadd.f32 %v1005_v11, %v1321_v6 }
 0x1b9   : > { %v570_v13 = vpop.f32.mrf.mxu1 }
 0x1ba   : > { %1106 = vtanh.f32 %v579_v12  ;;  %v571_v14 = vadd.f32 %v1321_v6, %v570_v13 }
 0x1bb   : > { %v1008_v15 = vpop.f32.mrf.mxu1 }
 0x1bc   : > { %1108 = vtanh.f32 %v571_v14  ;;  %v592_v16 = vadd.f32 %v1008_v15, %v1321_v6 }
 0x1bd   : > { %v583_v17 = vpop.f32.mrf.mxu1 }
 0x1be   : > { %1110 = vtanh.f32 %v592_v16  ;;  %v584_v18 = vadd.f32 %v1321_v6, %v583_v17 }
 0x1bf   : > { %v1009_v19 = vpop.f32.mrf.mxu1 }
 0x1c0   : > { %1112 = vtanh.f32 %v584_v18  ;;  %v595_v20 = vadd.f32 %v1009_v19, %v1321_v6 }
 0x1c1   : > { %v586_v21 = vpop.f32.mrf.mxu1 }
 0x1c2   : > { %1114 = vtanh.f32 %v595_v20  ;;  %v587_v23 = vadd.f32 %v1321_v6, %v586_v21 }
 0x1c3   : > { %v1103_v24 = vpop.eup %1102  ;;  %v1012_v25 = vpop.f32.mrf.mxu1 }
 0x1c4   : > { %1116 = vtanh.f32 %v587_v23  ;;  %v608_v26 = vadd.f32 %v1012_v25, %v1321_v6  ;;  %v655_v27 = vmul.f32 %v1103_v24, %v1333_v22  ;;  %v733_v25 = vlaneseq }
 0x1c5   : > { %v1105_v28 = vpop.eup %1104  ;;  %v599_v29 = vpop.f32.mrf.mxu1 }
 0x1c6   : > { %1118 = vtanh.f32 %v608_v26  ;;  %v600_v30 = vadd.f32 %v1321_v6, %v599_v29  ;;  %v675_v31 = vsel %vm508_vm1, %v655_v27, 0.0  ;;  %v653_v32 = vmul.f32 %v1105_v28, %v1333_v22 }
 0x1c7   : > { %v1107_v33 = vpop.eup %1106  ;;  %676 = vadd.xlane.f32.xlu1 %v675_v31  ;;  %v1013_v34 = vpop.f32.mrf.mxu1  ;;  %v1376_v26 = vand.u32 127, %v733_v25  ;;  %v1379_v28 = vshrl.u32 %v733_v25, 7 }
 0x1c8   : > { %1120 = vtanh.f32 %v600_v30  ;;  %v611_v35 = vadd.f32 %v1013_v34, %v1321_v6  ;;  %v669_v36 = vsel %vm508_vm1, %v653_v32, 0.0  ;;  %v656_v37 = vmul.f32 %v1107_v33, %v1333_v22 }
 0x1c9   : > { %v1109_v38 = vpop.eup %1108  ;;  %v602_v39 = vpop.f32.mrf.mxu1  ;;  %670 = vadd.xlane.f32.xlu0 %v669_v36  ;;  %v739_v27 = vadd.s32 4294967288, %v1376_v26  ;;  %v746_v31 = vadd.s32 4294967280, %v1376_v26  ;;  %v753_v33 = vadd.s32 4294967272, %v1376_v26 }
 0x1ca   : > { %1122 = vtanh.f32 %v611_v35  ;;  %v603_v40 = vadd.f32 %v1321_v6, %v602_v39  ;;  %v678_v41 = vsel %vm508_vm1, %v656_v37, 0.0  ;;  %v654_v42 = vmul.f32 %v1109_v38, %v1333_v22 }
 0x1cb   : > { %v1111_v43 = vpop.eup %1110  ;;  %679 = vadd.xlane.f32.xlu1 %v678_v41  ;;  %v1016_v44 = vpop.f32.mrf.mxu1  ;;  %v742_v32 = vsub.s32 %v739_v27, %v1379_v28  ;;  %v749_v35 = vsub.s32 %v746_v31, %v1379_v28  ;;  %v760_v37 = vadd.s32 4294967264, %v1376_v26  ;;  %v756_v41 = vsub.s32 %v753_v33, %v1379_v28 }
 0x1cc   : > { %1124 = vtanh.f32 %v603_v40  ;;  %v624_v45 = vadd.f32 %v1016_v44, %v1321_v6  ;;  %v672_v46 = vsel %vm508_vm1, %v654_v42, 0.0  ;;  %v659_v47 = vmul.f32 %v1111_v43, %v1333_v22 }
 0x1cd   : > { %v1113_v48 = vpop.eup %1112  ;;  %v615_v49 = vpop.f32.mrf.mxu1  ;;  %673 = vadd.xlane.f32.xlu0 %v672_v46  ;;  %v767_v40 = vadd.s32 4294967256, %v1376_v26  ;;  %v763_v46 = vsub.s32 %v760_v37, %v1379_v28  ;;  %v837_v27 = vadd.s32 4294967176, %v1376_v26 }
 0x1ce   : > { %v616_v50 = vadd.f32 %v1321_v6, %v615_v49  ;;  %1126 = vtanh.f32 %v624_v45  ;;  %v687_v53 = vsel %vm508_vm1, %v659_v47, 0.0  ;;  %v657_v56 = vmul.f32 %v1113_v48, %v1333_v22 }
 0x1cf   : > { %v1115_v51 = vpop.eup %1114  ;;  %v1017_v52 = vpop.f32.mrf.mxu1  ;;  %v774_v45 = vadd.s32 4294967248, %v1376_v26  ;;  %v770_v49 = vsub.s32 %v767_v40, %v1379_v28 }
 0x1d0   : > { %1128 = vtanh.f32 %v616_v50  ;;  %v627_v54 = vadd.f32 %v1017_v52, %v1321_v6  ;;  %v660_v55 = vmul.f32 %v1115_v51, %v1333_v22  ;;  %v681_v63 = vsel %vm508_vm1, %v657_v56, 0.0 }
 0x1d1   : > { %v1117_v57 = vpop.eup %1116  ;;  %v618_v58 = vpop.f32.mrf.mxu1  ;;  %688 = vadd.xlane.f32.xlu0 %v687_v53  ;;  %v781_v51 = vadd.s32 4294967240, %v1376_v26  ;;  %v777_v53 = vsub.s32 %v774_v45, %v1379_v28 }
 0x1d2   : > { %v619_v59 = vadd.f32 %v1321_v6, %v618_v58  ;;  %v690_v60 = vsel %vm508_vm1, %v660_v55, 0.0  ;;  %v658_v61 = vmul.f32 %v1117_v57, %v1333_v22  ;;  %1130 = vtanh.f32 %v627_v54 }
 0x1d3   : > { %v1119_v62 = vpop.eup %1118  ;;  %691 = vadd.xlane.f32.xlu1 %v690_v60  ;;  %v788_v55 = vadd.s32 4294967232, %v1376_v26  ;;  %v795_v60 = vadd.s32 4294967224, %v1376_v26 }
 0x1d4   : > { %1132 = vtanh.f32 %v619_v59  ;;  %v663_v0 = vmul.f32 %v1119_v62, %v1333_v22  ;;  %v684_v2 = vsel %vm508_vm1, %v658_v61, 0.0  ;;  %v784_v61 = vsub.s32 %v781_v51, %v1379_v28 }
 0x1d5   : > { %v1121_v1 = vpop.eup %1120  ;;  %682 = vadd.xlane.f32.xlu0 %v681_v63  ;;  %v802_v62 = vadd.s32 4294967216, %v1376_v26 }
 0x1d6   : > { %v699_v4 = vsel %vm508_vm1, %v663_v0, 0.0  ;;  %v661_v6 = vmul.f32 %v1121_v1, %v1333_v22 }
 0x1d7   : > { %v1123_v3 = vpop.eup %1122  ;;  %685 = vadd.xlane.f32.xlu1 %v684_v2  ;;  %v809_v2 = vadd.s32 4294967208, %v1376_v26 }
 0x1d8   : > { %v664_v5 = vmul.f32 %v1123_v3, %v1333_v22  ;;  %v693_v11 = vsel %vm508_vm1, %v661_v6, 0.0  ;;  %v791_v3 = vsub.s32 %v788_v55, %v1379_v28 }
 0x1d9   : > { %v1125_v7 = vpop.eup %1124  ;;  %700 = vadd.xlane.f32.xlu0 %v699_v4 }
 0x1da   : > { %v702_v8 = vsel %vm508_vm1, %v664_v5, 0.0  ;;  %v662_v9 = vmul.f32 %v1125_v7, %v1333_v22  ;;  %v816_v5 = vadd.s32 4294967200, %v1376_v26  ;;  %v798_v7 = vsub.s32 %v795_v60, %v1379_v28 }
 0x1db   : > { %703 = vadd.xlane.f32.xlu1 %v702_v8  ;;  %v1127_v10 = vpop.eup %1126 }
 0x1dc   : > { %v696_v13 = vsel %vm508_vm1, %v662_v9, 0.0  ;;  %v667_v17 = vmul.f32 %v1127_v10, %v1333_v22  ;;  %v805_v9 = vsub.s32 %v802_v62, %v1379_v28 }
 0x1dd   : > { %v1129_v12 = vpop.eup %1128  ;;  %694 = vadd.xlane.f32.xlu0 %v693_v11  ;;  %v812_v11 = vsub.s32 %v809_v2, %v1379_v28 }
 0x1de   : > { %v665_v14 = vmul.f32 %v1129_v12, %v1333_v22  ;;  %v711_v21 = vsel %vm508_vm1, %v667_v17, 0.0  ;;  %v830_v17 = vadd.s32 4294967184, %v1376_v26 }
 0x1df   : > { %697 = vadd.xlane.f32.xlu1 %v696_v13  ;;  %v1131_v15 = vpop.eup %1130  ;;  %v823_v13 = vadd.s32 4294967192, %v1376_v26 }
 0x1e0   : > { %v705_v16 = vsel %vm508_vm1, %v665_v14, 0.0  ;;  %v668_v23 = vmul.f32 %v1131_v15, %v1333_v22  ;;  %v833_v31 = vsub.s32 %v830_v17, %v1379_v28 }
 0x1e1   : > { %v1133_v18 = vpop.eup %1132  ;;  %706 = vadd.xlane.f32.xlu0 %v705_v16  ;;  %v819_v16 = vsub.s32 %v816_v5, %v1379_v28  ;;  %v826_v25 = vsub.s32 %v823_v13, %v1379_v28 }
 0x1e2   : > { %v666_v19 = vmul.f32 %v1133_v18, %v1333_v22  ;;  %v714_v24 = vsel %vm508_vm1, %v668_v23, 0.0  ;;  %v737_v22 = vsub.s32 %v1376_v26, %v1379_v28 }
 0x1e4   : > { %v708_v20 = vsel %vm508_vm1, %v666_v19, 0.0 }
 0x1e5   : > { %709 = vadd.xlane.f32.xlu1 %v708_v20  ;;  %712 = vadd.xlane.f32.xlu0 %v711_v21 }
 0x1e9   : > { %715 = vadd.xlane.f32.xlu1 %v714_v24 }
 0x250   : > { %v677_v29 = vpop.xlane.xlu1 %676 }
 0x251   : > { %v750_v44 = vrot.slane %v677_v29, %v749_v35  ;;  %v840_v35 = vsub.s32 %v837_v27, %v1379_v28 }
 0x252   : > { %v671_v30 = vpop.xlane.xlu0 %670 }
 0x253   : > { %v738_v38 = vrot.slane %v671_v30, %v737_v22 }
 0x254   : > { %v680_v39 = vpop.xlane.xlu1 %679 }
 0x255   : > { %v757_v50 = vrot.slane %v680_v39, %v756_v41 }
 0x256   : > { %v674_v34 = vpop.xlane.xlu0 %673 }
 0x257   : > { %v743_v36 = vrot.slane %v674_v34, %v742_v32 }
 0x259   : > { %v745_v42 = vsel %vm744_vm2, %v743_v36, %v738_v38 }
 0x25a   : > { %v689_v43 = vpop.xlane.xlu0 %688  ;;  %v752_v48 = vsel %vm751_vm3, %v750_v44, %v745_v42 }
 0x25b   : > { %v759_v56 = vsel %vm758_vm4, %v757_v50, %v752_v48  ;;  %v778_v0 = vrot.slane %v689_v43, %v777_v53 }
 0x25c   : > { %v692_v47 = vpop.xlane.xlu1 %691 }
 0x25d   : > { %v785_v8 = vrot.slane %v692_v47, %v784_v61 }
 0x25e   : > { %v683_v52 = vpop.xlane.xlu0 %682 }
 0x25f   : > { %v764_v54 = vrot.slane %v683_v52, %v763_v46 }
 0x260   : > { %v686_v57 = vpop.xlane.xlu1 %685 }
 0x261   : > { %v766_v58 = vsel %vm765_vm5, %v764_v54, %v759_v56  ;;  %v771_v59 = vrot.slane %v686_v57, %v770_v49 }
 0x262   : > { %v701_v63 = vpop.xlane.xlu0 %700 }
 0x263   : > { %v773_v1 = vsel %vm772_vm6, %v771_v59, %v766_v58  ;;  %v806_v20 = vrot.slane %v701_v63, %v805_v9 }
 0x264   : > { %v704_v4 = vpop.xlane.xlu1 %703  ;;  %v780_v6 = vsel %vm779_vm7, %v778_v0, %v773_v1 }
 0x265   : > { %v787_v14 = vsel %vm786_vm8, %v785_v8, %v780_v6  ;;  %v813_v23 = vrot.slane %v704_v4, %v812_v11 }
 0x266   : > { %v695_v10 = vpop.xlane.xlu0 %694 }
 0x267   : > { %v792_v12 = vrot.slane %v695_v10, %v791_v3 }
 0x268   : > { %v698_v15 = vpop.xlane.xlu1 %697 }
 0x269   : > { %v794_v18 = vsel %vm793_vm9, %v792_v12, %v787_v14  ;;  %v799_v19 = vrot.slane %v698_v15, %v798_v7 }
 0x26a   : > { %v707_v21 = vpop.xlane.xlu0 %706 }
 0x26b   : > { %v801_v24 = vsel %vm800_vm10, %v799_v19, %v794_v18  ;;  %v820_v30 = vrot.slane %v707_v21, %v819_v16 }
 0x26c   : > { %v808_v29 = vsel %vm807_vm11, %v806_v20, %v801_v24 }
 0x26d   : > { %v815_v32 = vsel %vm814_vm12, %v813_v23, %v808_v29 }
 0x26e   : > { %v710_v22 = vpop.xlane.xlu1 %709  ;;  %v713_v33 = vpop.xlane.xlu0 %712  ;;  %v822_v36 = vsel %vm821_vm13, %v820_v30, %v815_v32 }
 0x26f   : > { %v827_v34 = vrot.slane %v710_v22, %v826_v25  ;;  %v834_v37 = vrot.slane %v713_v33, %v833_v31 }
 0x271   : > { %v829_v38 = vsel %vm828_vm14, %v827_v34, %v822_v36 }
 0x272   : > { %v716_v26 = vpop.xlane.xlu1 %715  ;;  %v836_v40 = vsel %vm835_vm15, %v834_v37, %v829_v38 }
 0x273   : > { %v841_v39 = vrot.slane %v716_v26, %v840_v35 }
 0x275   : > { %v843_v41 = vsel %vm842_vm0, %v841_v39, %v836_v40 }
 0x276   : > { %845 = vst [vmem:[%s244_s17] sm:$0x1] %v843_v41 }
 0x277   : > { %1147 = shalt.err (!%p1144_p3)
}
 0x278   : > { %s1148_s11 = scalar_lea.hbm %s1417_s25, 16  ;;  %s1152_s14 = scalar_lea.hbm %s1458_s6, 32 }
 0x279   : > { %p1149_p4 = scmp.ne.s32.totalorder %s1417_s25, %s1148_s11  ;;  %p1153_p9 = scmp.lt.s32.totalorder %s1417_s25, %s1458_s6 }
 0x27a   : > { %p1154_p10 = scmp.lt.s32.totalorder %s1152_s14, %s1148_s11 }
 0x27b   : > { %p1150_p7 = pnand %p1149_p4, %p1267_p5 }
 0x27c   : > { %p1155_p11 = por %p1154_p10, %p1153_p9 }
 0x27d   : > { %p1151_p8 = pneg %p1150_p7 }
 0x27f   : > { %p1156_p12 = pnand %p1155_p11, %p1151_p8 }
 0x281   : > { %1159 = shalt.err (!%p1156_p12)
}
 0x282   : > { %1018 = dma.vmem_to_hbm [thread:$0]  (%p1267_p5), %s860_s18, 16, %s1417_s25, %s847_s26  }
 0x283 PF: > { %p1024_p13 = scmp.ge.s32.totalorder %s1194_s24, 2  ;;  %s871_s17 = sand.u32 1, %s1182_s21  }
 0x284   : > { %s872_s19 = scalar_lea.sflag [#allocation3], %s871_s17 }
 0x285   : > { %p1021_p0 = pnand %p1024_p13, %p1271_p6 }
 0x287   : > { %p1022_p1 = pneg %p1021_p0 }
 0x289   : > { %1177 = dma.done.wait (%p1022_p1), %s872_s19, 16  }
 0x28a   : > { %1179 = vsyncadd (%p1022_p1), %s872_s19, 4294967280  ;;  %p16_p2 = scmp.ge.s32.totalorder %s1255_s27, 4   ;;  %s1461_s21 = smov %s1186_s22 }
 0x28b   : > { %s1462_s22 = smov %s1190_s23  ;;  %s1463_s23 = smov %s1265_s30 }
 0x28c   : > { %s1464_s24 = smov %s1255_s27  ;;  %18 = sbr.rel (!%p16_p2) target bundleno = 3 (0x3), region = 79 }
 0x291   :  { %876 = vsyncpa [#allocation3], 1 }
 0x292   :  { %878 = vsyncpa [#allocation3 + $0x1], 1 }

</bundles_post_ra>
